<compile_context>
chip_gen: v6e
topology: v6e:2x2x1
jax: 0.10.0
libtpu: 0.0.40
codegen_flags: <defaults>
</compile_context>

<pallas_src>
import jax
import jax.numpy as jnp
import numpy as np
from jax.experimental import pallas as pl
from jax.experimental.pallas import tpu as pltpu


# ----------------------------------------------------------------------------
# Pallas kernel: plane sweep (variance cost volume + recurrent regularization
# + soft-argmax accumulation across depth hypotheses)
# ----------------------------------------------------------------------------
def _plane_sweep_kernel(ref_ref, vol_ref, dhyp_ref,
                        wvT_ref, wsT_ref, bs_ref, woT_ref, bo_ref,
                        depth_out_ref, prob_out_ref,
                        state, exp_sum, depth_img, max_prob):
    d = pl.program_id(2)

    @pl.when(d == 0)
    def _init():
        state[...] = jnp.zeros_like(state)
        exp_sum[...] = jnp.zeros_like(exp_sum)
        depth_img[...] = jnp.zeros_like(depth_img)
        max_prob[...] = jnp.zeros_like(max_prob)

    ref = ref_ref[0].astype(jnp.float32)        # [C, TP]
    w = vol_ref[0, 0].astype(jnp.float32)       # [Vsrc, C, TP]
    nviews = w.shape[0] + 1                     # ref view + source views
    inv_v = 1.0 / float(nviews)

    # variance over views: volume_sq_sum/V - (volume_sum/V)^2
    vol_sum = ref + jnp.sum(w, axis=0)          # [C, TP]
    vol_sq_sum = ref * ref + jnp.sum(w * w, axis=0)
    var = vol_sq_sum * inv_v - (vol_sum * inv_v) ** 2

    # Surrogate slice_RED_Regularization: recurrent 1x1-conv (channel matmul on
    # the MXU) with a single full-resolution hidden state, transposed layout.
    # TODO(synk): the real slice_RED_Regularization (multi-scale recurrent
    # encoder/decoder with state1..state4) is not provided in the reference
    # source; only a single-scale recurrent state is modeled here.
    new_state = jnp.tanh(
        jnp.dot(wvT_ref[...], var, preferred_element_type=jnp.float32)
        + jnp.dot(wsT_ref[...], state[...], preferred_element_type=jnp.float32)
        + bs_ref[...])                                             # [S, TP]
    state[...] = new_state
    cost = jnp.dot(woT_ref[...], new_state,
                   preferred_element_type=jnp.float32) + bo_ref[...]   # [1, TP]

    # TODO(synk): PyTorch accumulates in float64; TPU uses float32 with a clamp
    # on the cost to guard exp() overflow.
    cost = jnp.minimum(cost, 60.0)
    prob = jnp.exp(cost)                        # [1, TP]
    dval = dhyp_ref[0, 0]                       # [1, TP]

    max_prob[...] = jnp.maximum(max_prob[...], prob)
    depth_img[...] = depth_img[...] + dval * prob
    exp_sum[...] = exp_sum[...] + prob

    @pl.when(d == pl.num_programs(2) - 1)
    def _finalize():
        inv = pl.reciprocal(exp_sum[...] + 1e-10, approx=True)
        depth_out_ref[...] = (depth_img[...] * inv)[None]   # (1, 1, TP) lane-dense
        prob_out_ref[...] = (max_prob[...] * inv)[None]


def _pick_pixel_tile(P, C, Vs, S, vmem_budget_bytes=16 << 20):
    """Largest 128-multiple pixel tile (dividing P) whose double-buffered
    streams + scratch fit the VMEM budget; whole image if it is small."""
    per_pixel = (2 * 2 * Vs * C      # warped volume (bf16, double-buffered)
                 + 2 * 2 * C         # reference feature (bf16, double-buffered)
                 + 2 * 4             # depth hypothesis (f32, double-buffered)
                 + 2 * 2 * 4         # two f32 outputs (double-buffered)
                 + (S + 3) * 4)      # VMEM scratch accumulators
    cap = max(128, vmem_budget_bytes // per_pixel)
    if P <= cap:
        return P
    t = min((cap // 128) * 128, (P // 128) * 128)
    while t >= 128:
        if P % t == 0:
            return t
        t -= 128
    # TODO(synk): P has no 128-multiple divisor; fall back to whole image.
    return P


def plane_sweep_pallas(ref, vol, dhyp, reg_params):
    """ref: [B, C, P] (bf16); vol: [B, D, Vsrc, C, P] (bf16);
    dhyp: [B, D, 1, P] (f32). Returns (depth [B,1,P], prob [B,1,P]) in f32."""
    B, D, Vs, C, P = vol.shape
    S = reg_params['wsT'].shape[0]
    TP = _pick_pixel_tile(P, C, Vs, S)
    np_tiles = P // TP

    grid_spec = pltpu.PrefetchScalarGridSpec(
        num_scalar_prefetch=0,
        grid=(B, np_tiles, D),
        in_specs=[
            # reference feature: d-independent index_map -> fetched once / (b,p)
            pl.BlockSpec((1, C, TP), lambda b, p, d: (b, 0, p)),
            # warped source-view volume (the only per-depth bulk stream)
            pl.BlockSpec((1, 1, Vs, C, TP), lambda b, p, d: (b, d, 0, 0, p)),
            # lane-dense per-pixel depth hypothesis
            pl.BlockSpec((1, 1, 1, TP), lambda b, p, d: (b, d, 0, p)),
            # tiny regularizer weights (constant index -> single DMA, stays resident)
            pl.BlockSpec((S, C), lambda b, p, d: (0, 0)),
            pl.BlockSpec((S, S), lambda b, p, d: (0, 0)),
            pl.BlockSpec((S, 1), lambda b, p, d: (0, 0)),
            pl.BlockSpec((1, S), lambda b, p, d: (0, 0)),
            pl.BlockSpec((1, 1), lambda b, p, d: (0, 0)),
        ],
        out_specs=[
            pl.BlockSpec((1, 1, TP), lambda b, p, d: (b, 0, p)),
            pl.BlockSpec((1, 1, TP), lambda b, p, d: (b, 0, p)),
        ],
        scratch_shapes=[
            pltpu.VMEM((S, TP), jnp.float32),   # recurrent state
            pltpu.VMEM((1, TP), jnp.float32),   # exp_sum
            pltpu.VMEM((1, TP), jnp.float32),   # depth_image
            pltpu.VMEM((1, TP), jnp.float32),   # max_prob_image
        ],
    )

    depth_map, prob_map = pl.pallas_call(
        _plane_sweep_kernel,
        out_shape=(jax.ShapeDtypeStruct((B, 1, P), jnp.float32),
                   jax.ShapeDtypeStruct((B, 1, P), jnp.float32)),
        grid_spec=grid_spec,
        compiler_params=pltpu.CompilerParams(
            dimension_semantics=("parallel", "parallel", "arbitrary"),
            vmem_limit_bytes=48 * 1024 * 1024),
    )(ref, vol, dhyp, reg_params['wvT'], reg_params['wsT'], reg_params['bs'],
      reg_params['woT'], reg_params['bo'])
    return depth_map, prob_map


# ----------------------------------------------------------------------------
# Glue: feature extraction, warping, depth sampling (plain JAX)
# ----------------------------------------------------------------------------
def _conv2d(x, w, b, stride=1):
    y = jax.lax.conv_general_dilated(
        x, w, (stride, stride), 'SAME',
        dimension_numbers=('NCHW', 'OIHW', 'NCHW'))
    return y + b[None, :, None, None]


def _relu(x):
    return jnp.maximum(x, 0.0)


def _resize_nchw(x, h, w):
    B, C = x.shape[0], x.shape[1]
    return jax.image.resize(x, (B, C, h, w), method='linear', antialias=False)


def _feature_net(x, p):
    """Surrogate FeatureNet / ResNet18_block3: 3 output stages at 1/4, 1/2, 1 res."""
    B, _, H, W = x.shape
    y = _relu(_conv2d(x, p['w0'], p['b0'], 1))
    y = _relu(_conv2d(y, p['w1'], p['b1'], 2))      # H/2
    s1 = _relu(_conv2d(y, p['w2'], p['b2'], 2))     # H/4, C = 4*base
    s2 = _relu(_conv2d(_resize_nchw(s1, H // 2, W // 2), p['w3'], p['b3'], 1))  # 2*base
    s3 = _relu(_conv2d(_resize_nchw(s2, H, W), p['w4'], p['b4'], 1))            # base
    return {'stage1': s1, 'stage2': s2, 'stage3': s3}


def _bilinear_sample(fea, x, y):
    """fea: [B,C,H,W]; x,y: [B,D,P] pixel coords. Returns [B,D,C,P] (kernel layout)."""
    B, C, H, W = fea.shape
    D, P = x.shape[1], x.shape[2]
    fea_flat = fea.reshape(B, C, H * W)

    x0 = jnp.floor(x)
    y0 = jnp.floor(y)
    x1 = x0 + 1.0
    y1 = y0 + 1.0
    wx1 = x - x0
    wx0 = 1.0 - wx1
    wy1 = y - y0
    wy0 = 1.0 - wy1

    def gather(xi, yi):
        valid = ((xi >= 0) & (xi <= W - 1) & (yi >= 0) & (yi <= H - 1)).astype(fea.dtype)
        xic = jnp.clip(xi, 0, W - 1).astype(jnp.int32)
        yic = jnp.clip(yi, 0, H - 1).astype(jnp.int32)
        idx = (yic * W + xic).reshape(B, D * P)                         # [B, D*P]
        # Per-batch gather along the flattened spatial axis; avoids the
        # [B,D,C,H*W] broadcast materialization.
        g = jax.vmap(lambda f, i: jnp.take(f, i, axis=-1))(fea_flat, idx)  # [B,C,D*P]
        g = g.reshape(B, C, D, P).transpose(0, 2, 1, 3)                 # [B,D,C,P]
        return g * valid[:, :, None, :]

    out = (gather(x0, y0) * (wx0 * wy0)[:, :, None]
           + gather(x1, y0) * (wx1 * wy0)[:, :, None]
           + gather(x0, y1) * (wx0 * wy1)[:, :, None]
           + gather(x1, y1) * (wx1 * wy1)[:, :, None])
    return out                                                          # [B,D,C,P]


def homo_warping(src_fea, src_proj, ref_proj, depth_values):
    """src_fea [B,C,H,W], projs [B,4,4], depth_values [B,D,H,W] -> [B,D,C,P]."""
    # TODO(synk): grid_sample-style gather has no clean Pallas equivalent;
    # warping is done in plain JAX and the warped volume is fed to the kernel.
    B, C, H, W = src_fea.shape
    D = depth_values.shape[1]
    proj = jnp.einsum('bij,bjk->bik', src_proj, jnp.linalg.inv(ref_proj))
    rot = proj[:, :3, :3]
    trans = proj[:, :3, 3:4]

    yy, xx = jnp.meshgrid(jnp.arange(H, dtype=jnp.float32),
                          jnp.arange(W, dtype=jnp.float32), indexing='ij')
    xyz = jnp.stack([xx.reshape(-1), yy.reshape(-1),
                     jnp.ones(H * W, jnp.float32)], axis=0)          # [3, P]
    rot_xyz = jnp.einsum('bij,jp->bip', rot, xyz)                    # [B,3,P]
    rot_depth_xyz = rot_xyz[:, :, None, :] * depth_values.reshape(B, 1, D, H * W)
    proj_xyz = rot_depth_xyz + trans[:, :, :, None]                  # [B,3,D,P]
    z = proj_xyz[:, 2]
    z = jnp.where(jnp.abs(z) < 1e-6, 1e-6, z)
    x_src = proj_xyz[:, 0] / z
    y_src = proj_xyz[:, 1] / z
    return _bilinear_sample(src_fea, x_src, y_src)                   # [B,D,C,P]


def get_depth_range_samples(cur_depth, ndepth, depth_interval_pixel, shape):
    B, H, W = shape
    if cur_depth.ndim == 2:
        dmin = cur_depth[:, 0]
        dmax = cur_depth[:, -1]
        new_interval = (dmax - dmin) / (ndepth - 1)
        samples = dmin[:, None] + jnp.arange(ndepth, dtype=jnp.float32)[None] * new_interval[:, None]
        samples = jnp.broadcast_to(samples[:, :, None, None], (B, ndepth, H, W))
    else:
        dmin = jnp.clip(cur_depth - ndepth / 2.0 * depth_interval_pixel, 0.0, None)
        dmax = dmin + (ndepth - 1) * depth_interval_pixel
        new_interval = (dmax - dmin) / (ndepth - 1)
        samples = (dmin[:, None] +
                   jnp.arange(ndepth, dtype=jnp.float32)[None, :, None, None] * new_interval[:, None])
    return samples.astype(jnp.float32)


def compute_depth_stage(features, projs, depth_values, reg_params):
    """features: list of V [B,C,h,w]; projs: [B,V,4,4]; depth_values: [B,D,h,w]."""
    V = len(features)
    B, C, h, w = features[0].shape
    D = depth_values.shape[1]
    P = h * w

    ref_fea, ref_proj = features[0], projs[:, 0]

    # Only source views are streamed per-depth; the reference view is a
    # separate d-independent input (no broadcast over D in HBM).
    warped = [homo_warping(features[v], projs[:, v], ref_proj, depth_values)
              for v in range(1, V)]
    vol = jnp.stack(warped, axis=2)                 # [B, D, Vsrc, C, P]

    ref_flat = ref_fea.reshape(B, C, P)
    dhyp = depth_values.reshape(B, D, 1, P)

    depth_flat, prob_flat = plane_sweep_pallas(
        ref_flat.astype(jnp.bfloat16),
        vol.astype(jnp.bfloat16),
        dhyp.astype(jnp.float32),
        reg_params)
    return {'depth': depth_flat.reshape(B, h, w),
            'photometric_confidence': prob_flat.reshape(B, h, w)}


# ----------------------------------------------------------------------------
# Parameters (deterministic init) and full forward
# ----------------------------------------------------------------------------
NDEPTHS = [8, 4, 4]
DEPTH_RATIOS = [4, 2, 1]
MIN_INTERVAL = 2.5
STAGE_SCALES = [4.0, 2.0, 1.0]
BASE = 8
STATE_CH = 8
FEAT_OUT = [4 * BASE, 2 * BASE, BASE]          # FeatureNet surrogate out channels
DEP_OUT = [4 * BASE, 2 * BASE, BASE]           # ResNet18_block3 surrogate out channels
CAT_CH = [FEAT_OUT[i] + DEP_OUT[i] for i in range(3)]


def _init_conv(key, oc, ic, k=3):
    w = jax.random.normal(key, (oc, ic, k, k), jnp.float32) / np.sqrt(ic * k * k)
    return w, jnp.zeros((oc,), jnp.float32)


def _init_feature_params(key, in_ch):
    ks = jax.random.split(key, 5)
    p = {}
    p['w0'], p['b0'] = _init_conv(ks[0], BASE, in_ch)
    p['w1'], p['b1'] = _init_conv(ks[1], 2 * BASE, BASE)
    p['w2'], p['b2'] = _init_conv(ks[2], 4 * BASE, 2 * BASE)
    p['w3'], p['b3'] = _init_conv(ks[3], 2 * BASE, 4 * BASE)
    p['w4'], p['b4'] = _init_conv(ks[4], BASE, 2 * BASE)
    return p


def _init_reg_params(key, c_in):
    # Transposed layout for the pixels-on-lanes kernel: y = tanh(Wv x + Ws s + b)
    ks = jax.random.split(key, 3)
    return {
        'wvT': jax.random.normal(ks[0], (STATE_CH, c_in), jnp.float32) / np.sqrt(c_in),
        'wsT': jax.random.normal(ks[1], (STATE_CH, STATE_CH), jnp.float32) / np.sqrt(STATE_CH),
        'bs': jnp.zeros((STATE_CH, 1), jnp.float32),
        'woT': jax.random.normal(ks[2], (1, STATE_CH), jnp.float32) / np.sqrt(STATE_CH),
        'bo': jnp.zeros((1, 1), jnp.float32),
    }


def init_params(key):
    k_feat, k_dep, k1, k2, k3 = jax.random.split(key, 5)
    return {
        'feat': _init_feature_params(k_feat, 3),
        'dep': _init_feature_params(k_dep, 1),
        'reg': [_init_reg_params(k, c) for k, c in zip((k1, k2, k3), CAT_CH)],
    }


def infer_cascade_rednet(imgs, dAnythings, proj_matrices, depth_values, params):
    """imgs [B,V,3,H,W], dAnythings [B,V,1,H,W], proj_matrices dict stage->[B,V,4,4],
    depth_values [B,D0]."""
    B, V, _, H, W = imgs.shape

    total_features = []
    for v in range(V):
        imgfea = _feature_net(imgs[:, v], params['feat'])
        depfea = _feature_net(dAnythings[:, v], params['dep'])
        feats = {f'stage{i + 1}': jnp.concatenate(
            [imgfea[f'stage{i + 1}'], depfea[f'stage{i + 1}']], axis=1) for i in range(3)}
        total_features.append(feats)

    outputs = {}
    depth = None
    for s in range(3):
        stage = f'stage{s + 1}'
        feats_s = [f[stage] for f in total_features]
        projs_s = proj_matrices[stage]
        scale = int(STAGE_SCALES[s])
        h, w = H // scale, W // scale

        if depth is not None:
            cur_depth = jax.image.resize(depth, (B, H, W), method='linear', antialias=False)
        else:
            cur_depth = depth_values
        samples = get_depth_range_samples(
            cur_depth, NDEPTHS[s], DEPTH_RATIOS[s] * MIN_INTERVAL, (B, H, W))
        dv = jax.image.resize(samples, (B, NDEPTHS[s], h, w), method='linear', antialias=False)

        out_s = compute_depth_stage(feats_s, projs_s, dv, params['reg'][s])
        depth = out_s['depth']
        outputs[stage] = out_s
        outputs.update(out_s)
    return outputs


def make_proj_matrices(B, V):
    projs = {}
    for s, scale in enumerate(STAGE_SCALES):
        mats = []
        for v in range(V):
            M = np.eye(4, dtype=np.float32)
            M[0, 3] = 100.0 * v / scale   # small depth-dependent parallax along x
            mats.append(M)
        m = jnp.asarray(np.stack(mats, axis=0))          # [V,4,4]
        projs[f'stage{s + 1}'] = jnp.broadcast_to(m[None], (B, V, 4, 4))
    return projs


if __name__ == "__main__":
    key = jax.random.PRNGKey(0)
    k_img, k_dep, k_par = jax.random.split(key, 3)

    B, V, H, W = 2, 3, 16, 16
    imgs = jax.random.normal(k_img, (B, V, 3, H, W), jnp.float32)
    dAnythings = jax.random.normal(k_dep, (B, V, 1, H, W), jnp.float32)
    proj_matrices = make_proj_matrices(B, V)
    depth_values = jnp.broadcast_to(
        jnp.linspace(400.0, 600.0, NDEPTHS[0], dtype=jnp.float32)[None], (B, NDEPTHS[0]))

    params = init_params(k_par)

    outputs = infer_cascade_rednet(imgs, dAnythings, proj_matrices, depth_values, params)
    depth = jax.block_until_ready(outputs['depth'])
    conf = jax.block_until_ready(outputs['photometric_confidence'])
    assert depth.shape == (B, H, W) and conf.shape == (B, H, W)
    assert bool(jnp.all(jnp.isfinite(depth))) and bool(jnp.all(jnp.isfinite(conf)))
    print("KERNEL_OK")
</pallas_src>

<mosaic_0001>
module attributes {stable_mosaic.version = 11 : i64} {
  func.func @_plane_sweep_kernel(%arg0: i32, %arg1: i32, %arg2: i32, %arg3: memref<1x64x16xbf16, #tpu.memory_space<vmem>>, %arg4: memref<1x1x2x64x16xbf16, #tpu.memory_space<vmem>>, %arg5: memref<1x1x1x16xf32, #tpu.memory_space<vmem>>, %arg6: memref<8x64xf32, #tpu.memory_space<vmem>>, %arg7: memref<8x8xf32, #tpu.memory_space<vmem>>, %arg8: memref<8x1xf32, #tpu.memory_space<vmem>>, %arg9: memref<1x8xf32, #tpu.memory_space<vmem>>, %arg10: memref<1x1xf32, #tpu.memory_space<vmem>>, %arg11: memref<1x1x16xf32, #tpu.memory_space<vmem>>, %arg12: memref<1x1x16xf32, #tpu.memory_space<vmem>>, %arg13: memref<8x16xf32, #tpu.memory_space<vmem>>, %arg14: memref<1x16xf32, #tpu.memory_space<vmem>>, %arg15: memref<1x16xf32, #tpu.memory_space<vmem>>, %arg16: memref<1x16xf32, #tpu.memory_space<vmem>>) attributes {dimension_semantics = [#tpu.dimension_semantics<parallel>, #tpu.dimension_semantics<parallel>, #tpu.dimension_semantics<arbitrary>], iteration_bounds = array<i64: 2, 1, 8>, scalar_prefetch = 0 : i64, scratch_operands = 4 : i64, tpu.core_type = #tpu.core_type<tc>, window_params = [{transform_indices = @transform_0, window_bounds = array<i64: 1, 64, 16>}, {transform_indices = @transform_1, window_bounds = array<i64: 1, 1, 2, 64, 16>}, {transform_indices = @transform_2, window_bounds = array<i64: 1, 1, 1, 16>}, {pipeline_mode = #tpu.pipeline_mode<synchronous>, transform_indices = @transform_3, window_bounds = array<i64: 8, 64>}, {pipeline_mode = #tpu.pipeline_mode<synchronous>, transform_indices = @transform_4, window_bounds = array<i64: 8, 8>}, {pipeline_mode = #tpu.pipeline_mode<synchronous>, transform_indices = @transform_5, window_bounds = array<i64: 8, 1>}, {pipeline_mode = #tpu.pipeline_mode<synchronous>, transform_indices = @transform_6, window_bounds = array<i64: 1, 8>}, {pipeline_mode = #tpu.pipeline_mode<synchronous>, transform_indices = @transform_7, window_bounds = array<i64: 1, 1>}, {transform_indices = @transform_8, window_bounds = array<i64: 1, 1, 16>}, {transform_indices = @transform_9, window_bounds = array<i64: 1, 1, 16>}]} {
    %c0_i32 = arith.constant 0 : i32
    %0 = arith.cmpi eq, %arg2, %c0_i32 : i32
    %1 = arith.extui %0 : i1 to i32
    %c0_i32_0 = arith.constant 0 : i32
    %2 = arith.cmpi ne, %1, %c0_i32_0 : i32
    scf.if %2 {
      %cst_46 = arith.constant 0.000000e+00 : f32
      %55 = vector.broadcast %cst_46 : f32 to vector<8x16xf32>
      %c0_47 = arith.constant 0 : index
      %c0_48 = arith.constant 0 : index
      %56 = vector.load %arg13[%c0_47, %c0_48] : memref<8x16xf32, #tpu.memory_space<vmem>>, vector<8x16xf32>
      tpu.vector_store %arg13[%c0_47, %c0_48], %55 {strides = array<i32>} : memref<8x16xf32, #tpu.memory_space<vmem>>, vector<8x16xf32>,
      %cst_49 = arith.constant 0.000000e+00 : f32
      %57 = vector.broadcast %cst_49 : f32 to vector<1x16xf32>
      %c0_50 = arith.constant 0 : index
      %c0_51 = arith.constant 0 : index
      %58 = vector.load %arg14[%c0_50, %c0_51] : memref<1x16xf32, #tpu.memory_space<vmem>>, vector<1x16xf32>
      tpu.vector_store %arg14[%c0_50, %c0_51], %57 {strides = array<i32>} : memref<1x16xf32, #tpu.memory_space<vmem>>, vector<1x16xf32>,
      %cst_52 = arith.constant 0.000000e+00 : f32
      %59 = vector.broadcast %cst_52 : f32 to vector<1x16xf32>
      %c0_53 = arith.constant 0 : index
      %c0_54 = arith.constant 0 : index
      %60 = vector.load %arg15[%c0_53, %c0_54] : memref<1x16xf32, #tpu.memory_space<vmem>>, vector<1x16xf32>
      tpu.vector_store %arg15[%c0_53, %c0_54], %59 {strides = array<i32>} : memref<1x16xf32, #tpu.memory_space<vmem>>, vector<1x16xf32>,
      %cst_55 = arith.constant 0.000000e+00 : f32
      %61 = vector.broadcast %cst_55 : f32 to vector<1x16xf32>
      %c0_56 = arith.constant 0 : index
      %c0_57 = arith.constant 0 : index
      %62 = vector.load %arg16[%c0_56, %c0_57] : memref<1x16xf32, #tpu.memory_space<vmem>>, vector<1x16xf32>
      tpu.vector_store %arg16[%c0_56, %c0_57], %61 {strides = array<i32>} : memref<1x16xf32, #tpu.memory_space<vmem>>, vector<1x16xf32>,
    } else {
    }
    %c0 = arith.constant 0 : index
    %c0_1 = arith.constant 0 : index
    %c0_2 = arith.constant 0 : index
    %3 = vector.load %arg3[%c0, %c0_1, %c0_2] : memref<1x64x16xbf16, #tpu.memory_space<vmem>>, vector<1x64x16xbf16>
    %4 = vector.shape_cast %3 : vector<1x64x16xbf16> to vector<64x16xbf16>
    %5 = arith.extf %4 : vector<64x16xbf16> to vector<64x16xf32>
    %c0_3 = arith.constant 0 : index
    %c0_4 = arith.constant 0 : index
    %c0_5 = arith.constant 0 : index
    %c0_6 = arith.constant 0 : index
    %c0_7 = arith.constant 0 : index
    %6 = vector.load %arg4[%c0_3, %c0_4, %c0_5, %c0_6, %c0_7] : memref<1x1x2x64x16xbf16, #tpu.memory_space<vmem>>, vector<1x1x2x64x16xbf16>
    %7 = vector.shape_cast %6 : vector<1x1x2x64x16xbf16> to vector<2x64x16xbf16>
    %8 = arith.extf %7 : vector<2x64x16xbf16> to vector<2x64x16xf32>
    %cst = arith.constant dense<0.000000e+00> : vector<64x16xf32>
    %9 = vector.multi_reduction <add>, %8, %cst [0] : vector<2x64x16xf32> to vector<64x16xf32>
    %10 = arith.addf %5, %9 : vector<64x16xf32>
    %11 = arith.mulf %5, %5 : vector<64x16xf32>
    %12 = arith.mulf %8, %8 : vector<2x64x16xf32>
    %cst_8 = arith.constant dense<0.000000e+00> : vector<64x16xf32>
    %13 = vector.multi_reduction <add>, %12, %cst_8 [0] : vector<2x64x16xf32> to vector<64x16xf32>
    %14 = arith.addf %11, %13 : vector<64x16xf32>
    %cst_9 = arith.constant 0.333333343 : f32
    %15 = vector.broadcast %cst_9 : f32 to vector<64x16xf32>
    %16 = arith.mulf %14, %15 : vector<64x16xf32>
    %cst_10 = arith.constant 0.333333343 : f32
    %17 = vector.broadcast %cst_10 : f32 to vector<64x16xf32>
    %18 = arith.mulf %10, %17 : vector<64x16xf32>
    %19 = arith.mulf %18, %18 : vector<64x16xf32>
    %20 = arith.subf %16, %19 : vector<64x16xf32>
    %c0_11 = arith.constant 0 : index
    %c0_12 = arith.constant 0 : index
    %21 = vector.load %arg6[%c0_11, %c0_12] : memref<8x64xf32, #tpu.memory_space<vmem>>, vector<8x64xf32>
    %cst_13 = arith.constant dense<0.000000e+00> : vector<8x16xf32>
    %22 = tpu.matmul %21, %20, %cst_13 {dimension_numbers = #tpu.dot_dimension_numbers<[1], [0], [0], [1], [0, 0, 1, 1], [], []>} : vector<8x64xf32>, vector<64x16xf32>, vector<8x16xf32> -> vector<8x16xf32>
    %c0_14 = arith.constant 0 : index
    %c0_15 = arith.constant 0 : index
    %23 = vector.load %arg7[%c0_14, %c0_15] : memref<8x8xf32, #tpu.memory_space<vmem>>, vector<8x8xf32>
    %c0_16 = arith.constant 0 : index
    %c0_17 = arith.constant 0 : index
    %24 = vector.load %arg13[%c0_16, %c0_17] : memref<8x16xf32, #tpu.memory_space<vmem>>, vector<8x16xf32>
    %cst_18 = arith.constant dense<0.000000e+00> : vector<8x16xf32>
    %25 = tpu.matmul %23, %24, %cst_18 {dimension_numbers = #tpu.dot_dimension_numbers<[1], [0], [0], [1], [0, 0, 1, 1], [], []>} : vector<8x8xf32>, vector<8x16xf32>, vector<8x16xf32> -> vector<8x16xf32>
    %26 = arith.addf %22, %25 : vector<8x16xf32>
    %c0_19 = arith.constant 0 : index
    %c0_20 = arith.constant 0 : index
    %27 = vector.load %arg8[%c0_19, %c0_20] : memref<8x1xf32, #tpu.memory_space<vmem>>, vector<8x1xf32>
    %28 = vector.broadcast %27 : vector<8x1xf32> to vector<8x16xf32>
    %29 = arith.addf %26, %28 : vector<8x16xf32>
    %30 = math.tanh %29 : vector<8x16xf32>
    %c0_21 = arith.constant 0 : index
    %c0_22 = arith.constant 0 : index
    %31 = vector.load %arg13[%c0_21, %c0_22] : memref<8x16xf32, #tpu.memory_space<vmem>>, vector<8x16xf32>
    tpu.vector_store %arg13[%c0_21, %c0_22], %30 {strides = array<i32>} : memref<8x16xf32, #tpu.memory_space<vmem>>, vector<8x16xf32>,
    %c0_23 = arith.constant 0 : index
    %c0_24 = arith.constant 0 : index
    %32 = vector.load %arg9[%c0_23, %c0_24] : memref<1x8xf32, #tpu.memory_space<vmem>>, vector<1x8xf32>
    %cst_25 = arith.constant dense<0.000000e+00> : vector<1x16xf32>
    %33 = tpu.matmul %32, %30, %cst_25 {dimension_numbers = #tpu.dot_dimension_numbers<[1], [0], [0], [1], [0, 0, 1, 1], [], []>} : vector<1x8xf32>, vector<8x16xf32>, vector<1x16xf32> -> vector<1x16xf32>
    %c0_26 = arith.constant 0 : index
    %c0_27 = arith.constant 0 : index
    %34 = vector.load %arg10[%c0_26, %c0_27] : memref<1x1xf32, #tpu.memory_space<vmem>>, vector<1x1xf32>
    %35 = vector.broadcast %34 : vector<1x1xf32> to vector<1x16xf32>
    %36 = arith.addf %33, %35 : vector<1x16xf32>
    %cst_28 = arith.constant 6.000000e+01 : f32
    %37 = vector.broadcast %cst_28 : f32 to vector<1x16xf32>
    %38 = arith.minimumf %36, %37 : vector<1x16xf32>
    %39 = math.exp %38 : vector<1x16xf32>
    %c0_29 = arith.constant 0 : index
    %c0_30 = arith.constant 0 : index
    %c0_31 = arith.constant 0 : index
    %c0_32 = arith.constant 0 : index
    %40 = vector.load %arg5[%c0_29, %c0_30, %c0_31, %c0_32] : memref<1x1x1x16xf32, #tpu.memory_space<vmem>>, vector<1x1x1x16xf32>
    %41 = vector.shape_cast %40 : vector<1x1x1x16xf32> to vector<1x16xf32>
    %c0_33 = arith.constant 0 : index
    %c0_34 = arith.constant 0 : index
    %42 = vector.load %arg16[%c0_33, %c0_34] : memref<1x16xf32, #tpu.memory_space<vmem>>, vector<1x16xf32>
    %43 = arith.maximumf %42, %39 : vector<1x16xf32>
    %c0_35 = arith.constant 0 : index
    %c0_36 = arith.constant 0 : index
    %44 = vector.load %arg16[%c0_35, %c0_36] : memref<1x16xf32, #tpu.memory_space<vmem>>, vector<1x16xf32>
    tpu.vector_store %arg16[%c0_35, %c0_36], %43 {strides = array<i32>} : memref<1x16xf32, #tpu.memory_space<vmem>>, vector<1x16xf32>,
    %c0_37 = arith.constant 0 : index
    %c0_38 = arith.constant 0 : index
    %45 = vector.load %arg15[%c0_37, %c0_38] : memref<1x16xf32, #tpu.memory_space<vmem>>, vector<1x16xf32>
    %46 = arith.mulf %41, %39 : vector<1x16xf32>
    %47 = arith.addf %45, %46 : vector<1x16xf32>
    %c0_39 = arith.constant 0 : index
    %c0_40 = arith.constant 0 : index
    %48 = vector.load %arg15[%c0_39, %c0_40] : memref<1x16xf32, #tpu.memory_space<vmem>>, vector<1x16xf32>
    tpu.vector_store %arg15[%c0_39, %c0_40], %47 {strides = array<i32>} : memref<1x16xf32, #tpu.memory_space<vmem>>, vector<1x16xf32>,
    %c0_41 = arith.constant 0 : index
    %c0_42 = arith.constant 0 : index
    %49 = vector.load %arg14[%c0_41, %c0_42] : memref<1x16xf32, #tpu.memory_space<vmem>>, vector<1x16xf32>
    %50 = arith.addf %49, %39 : vector<1x16xf32>
    %c0_43 = arith.constant 0 : index
    %c0_44 = arith.constant 0 : index
    %51 = vector.load %arg14[%c0_43, %c0_44] : memref<1x16xf32, #tpu.memory_space<vmem>>, vector<1x16xf32>
    tpu.vector_store %arg14[%c0_43, %c0_44], %50 {strides = array<i32>} : memref<1x16xf32, #tpu.memory_space<vmem>>, vector<1x16xf32>,
    %c7_i32 = arith.constant 7 : i32
    %52 = arith.cmpi eq, %arg2, %c7_i32 : i32
    %53 = arith.extui %52 : i1 to i32
    %c0_i32_45 = arith.constant 0 : i32
    %54 = arith.cmpi ne, %53, %c0_i32_45 : i32
    scf.if %54 {
      %c0_46 = arith.constant 0 : index
      %c0_47 = arith.constant 0 : index
      %55 = vector.load %arg14[%c0_46, %c0_47] : memref<1x16xf32, #tpu.memory_space<vmem>>, vector<1x16xf32>
      %cst_48 = arith.constant 1.000000e-10 : f32
      %56 = vector.broadcast %cst_48 : f32 to vector<1x16xf32>
      %57 = arith.addf %55, %56 : vector<1x16xf32>
      %58 = tpu.reciprocal %57 {approx = true} : vector<1x16xf32> -> vector<1x16xf32>
      %c0_49 = arith.constant 0 : index
      %c0_50 = arith.constant 0 : index
      %59 = vector.load %arg15[%c0_49, %c0_50] : memref<1x16xf32, #tpu.memory_space<vmem>>, vector<1x16xf32>
      %60 = arith.mulf %59, %58 : vector<1x16xf32>
      %61 = vector.shape_cast %60 : vector<1x16xf32> to vector<1x1x16xf32>
      %c0_51 = arith.constant 0 : index
      %c0_52 = arith.constant 0 : index
      %c0_53 = arith.constant 0 : index
      %62 = vector.load %arg11[%c0_51, %c0_52, %c0_53] : memref<1x1x16xf32, #tpu.memory_space<vmem>>, vector<1x1x16xf32>
      tpu.vector_store %arg11[%c0_51, %c0_52, %c0_53], %61 {strides = array<i32>} : memref<1x1x16xf32, #tpu.memory_space<vmem>>, vector<1x1x16xf32>,
      %c0_54 = arith.constant 0 : index
      %c0_55 = arith.constant 0 : index
      %63 = vector.load %arg16[%c0_54, %c0_55] : memref<1x16xf32, #tpu.memory_space<vmem>>, vector<1x16xf32>
      %64 = arith.mulf %63, %58 : vector<1x16xf32>
      %65 = vector.shape_cast %64 : vector<1x16xf32> to vector<1x1x16xf32>
      %c0_56 = arith.constant 0 : index
      %c0_57 = arith.constant 0 : index
      %c0_58 = arith.constant 0 : index
      %66 = vector.load %arg12[%c0_56, %c0_57, %c0_58] : memref<1x1x16xf32, #tpu.memory_space<vmem>>, vector<1x1x16xf32>
      tpu.vector_store %arg12[%c0_56, %c0_57, %c0_58], %65 {strides = array<i32>} : memref<1x1x16xf32, #tpu.memory_space<vmem>>, vector<1x1x16xf32>,
    } else {
    }
    return
  }
  func.func @transform_0(%arg0: i32, %arg1: i32, %arg2: i32) -> (i32, i32, i32) {
    %c0_i32 = arith.constant 0 : i32
    %c0_i32_0 = arith.constant 0 : i32
    return %arg0, %c0_i32, %arg1 : i32, i32, i32
  }
  func.func @transform_1(%arg0: i32, %arg1: i32, %arg2: i32) -> (i32, i32, i32, i32, i32) {
    %c0_i32 = arith.constant 0 : i32
    %c0_i32_0 = arith.constant 0 : i32
    %c0_i32_1 = arith.constant 0 : i32
    return %arg0, %arg2, %c0_i32, %c0_i32_0, %arg1 : i32, i32, i32, i32, i32
  }
  func.func @transform_2(%arg0: i32, %arg1: i32, %arg2: i32) -> (i32, i32, i32, i32) {
    %c0_i32 = arith.constant 0 : i32
    %c0_i32_0 = arith.constant 0 : i32
    return %arg0, %arg2, %c0_i32, %arg1 : i32, i32, i32, i32
  }
  func.func @transform_3(%arg0: i32, %arg1: i32, %arg2: i32) -> (i32, i32) {
    %c0_i32 = arith.constant 0 : i32
    %c0_i32_0 = arith.constant 0 : i32
    %c0_i32_1 = arith.constant 0 : i32
    return %c0_i32, %c0_i32_0 : i32, i32
  }
  func.func @transform_4(%arg0: i32, %arg1: i32, %arg2: i32) -> (i32, i32) {
    %c0_i32 = arith.constant 0 : i32
    %c0_i32_0 = arith.constant 0 : i32
    %c0_i32_1 = arith.constant 0 : i32
    return %c0_i32, %c0_i32_0 : i32, i32
  }
  func.func @transform_5(%arg0: i32, %arg1: i32, %arg2: i32) -> (i32, i32) {
    %c0_i32 = arith.constant 0 : i32
    %c0_i32_0 = arith.constant 0 : i32
    %c0_i32_1 = arith.constant 0 : i32
    return %c0_i32, %c0_i32_0 : i32, i32
  }
  func.func @transform_6(%arg0: i32, %arg1: i32, %arg2: i32) -> (i32, i32) {
    %c0_i32 = arith.constant 0 : i32
    %c0_i32_0 = arith.constant 0 : i32
    %c0_i32_1 = arith.constant 0 : i32
    return %c0_i32, %c0_i32_0 : i32, i32
  }
  func.func @transform_7(%arg0: i32, %arg1: i32, %arg2: i32) -> (i32, i32) {
    %c0_i32 = arith.constant 0 : i32
    %c0_i32_0 = arith.constant 0 : i32
    %c0_i32_1 = arith.constant 0 : i32
    return %c0_i32, %c0_i32_0 : i32, i32
  }
  func.func @transform_8(%arg0: i32, %arg1: i32, %arg2: i32) -> (i32, i32, i32) {
    %c0_i32 = arith.constant 0 : i32
    %c0_i32_0 = arith.constant 0 : i32
    return %arg0, %c0_i32, %arg1 : i32, i32, i32
  }
  func.func @transform_9(%arg0: i32, %arg1: i32, %arg2: i32) -> (i32, i32, i32) {
    %c0_i32 = arith.constant 0 : i32
    %c0_i32_0 = arith.constant 0 : i32
    return %arg0, %c0_i32, %arg1 : i32, i32, i32
  }
}

</mosaic_0001>

<bundles_post_ra>
// kernel: tpu_custom_call.1
= control target key start
LH: loop header
LB: loop body
LE: loop exit
PB: predicated region body
PF: predicated region fallthrough
CT: control target
= control target key end

     0   :  { %s1735_s0 = inlined_call_operand.vmem [shape: bf16[2,64,16], index: 0, kind: input, shape index: {}]   ;;  %s1736_s1 = inlined_call_operand.vmem [shape: bf16[2,8,2,64,16], index: 1, kind: input, shape index: {}]   ;;  %s1737_s2 = inlined_call_operand.vmem [shape: f32[2,8,1,16], index: 2, kind: input, shape index: {}]   ;;  %s1738_s3 = inlined_call_operand.vmem [shape: f32[8,64], index: 3, kind: input, shape index: {}]   ;;  %s1739_s4 = inlined_call_operand.vmem [shape: f32[8,8], index: 4, kind: input, shape index: {}]   ;;  %s1740_s5 = inlined_call_operand.vmem [shape: f32[8,1], index: 5, kind: input, shape index: {}]   ;;  %s1741_s6 = inlined_call_operand.vmem [shape: f32[1,8], index: 6, kind: input, shape index: {}]   ;;  %s1742_s7 = inlined_call_operand.<no memory space> [shape: f32[1,1], index: 7, kind: input, shape index: {}]   ;;  %s1743_s8 = inlined_call_operand.hbm [shape: f32[2,1,16], index: 8, kind: output, shape index: {0}]   ;;  %s1744_s9 = inlined_call_operand.hbm [shape: f32[2,1,16], index: 9, kind: output, shape index: {1}]  }
   0x1   :  { %v15_v0 = vstv %s1742_s7 }
   0x2   :  { %16 = vst [vmem:[#allocation6] sm:$0x1] %v15_v0 }
   0x3   :  { %17 = vsyncpa [#allocation8], 0 }
   0x4   :  { %19 = vsyncpa [#allocation8 + $0x1], 0 }
   0x5   :  { %20 = vsyncpa [#allocation10], 0 }
   0x6   :  { %22 = vsyncpa [#allocation10 + $0x1], 0  ;;  %s1481_s11 = smov 0   ;;  %s1483_s12 = smov 0  }
   0x7   :  { %s1485_s13 = smov 0   ;;  %s1487_s14 = smov 0  }
   0x8   :  { %s1489_s15 = smov 0   ;;  %s1491_s16 = smov 0  }
   0x9   :  { %s1493_s17 = smov 0   ;;  %s1495_s7 = smov 0  }
   0xa LB: > { %1754 = sst [smem:[#allocation13_spill]] %s1392_s11  ;;  %s1090_s18 = sadd.s32 4294967295, %s1420_s7   ;;  %s1420_s7 = sphi %s1495_s7, %s28_s7   ;;  %s1416_s17 = sphi %s1493_s17, %s1775_s17   ;;  %s1412_s16 = sphi %s1491_s16, %s1774_s16   ;;  %s1408_s15 = sphi %s1489_s15, %s1773_s15   ;;  %s1404_s14 = sphi %s1487_s14, %s1772_s14   ;;  %s1400_s13 = sphi %s1485_s13, %s1771_s13   ;;  %s1396_s12 = sphi %s1483_s12, %s1770_s12   ;;  %s1392_s11 = sphi %s1481_s11, %s1769_s11  }
   0xb   : > { %1755 = sst [smem:[#allocation14_spill]] %s1396_s12  ;;  %s1091_s19 = sadd.s32 4294967294, %s1420_s7  }
   0xc   : > { %1756 = sst [smem:[#allocation15_spill]] %s1400_s13  ;;  %s40_s20 = sadd.s32 1, %s1412_s16 }
   0xd   : > { %1757 = sst [smem:[#allocation16_spill]] %s1412_s16  ;;  %p41_p0 = scmp.ge.s32.totalorder %s40_s20, 8 }
   0xe   : > { %1758 = sst [smem:[#allocation17_spill]] %s1416_s17  ;;  %s47_s21 = sadd.s32 1, %s1416_s17 }
   0xf   : > { %1759 = sst [smem:[#allocation18_spill]] %s1420_s7  ;;  %p259_p1 = scmp.ne.s32.totalorder %s1400_s13, %s1396_s12 }
  0x10   : > { %p260_p2 = scmp.eq.s32.totalorder %s1090_s18, 15  ;;  %s1777_s20 = smov (%p41_p0, %s40_s20), 0 }
  0x11   : > { %1760 = sst [smem:[#allocation19_spill]] %s1777_s20  ;;  %s1779_s21 = smov (!%p41_p0, %s47_s21), %s1416_s17 }
  0x12   : > { %p1530_p3 = por %p260_p2, %p259_p1  ;;  %p265_p4 = scmp.ne.s32.totalorder %s1396_s12, %s1392_s11 }
  0x13   : > { %p49_p5 = scmp.ge.s32.totalorder %s1779_s21, 2  ;;  %p266_p6 = scmp.eq.s32.totalorder %s1091_s19, 15 }
  0x14   : > { %p1094_p7 = scmp.ge.s32.totalorder %s1420_s7, 1  ;;  %p366_p8 = scmp.lt.s32.totalorder %s1420_s7, 17 }
  0x15   : > { %s1781_s21 = smov (%p49_p5, %s1779_s21), 0  ;;  %p1540_p9 = por %p266_p6, %p265_p4 }
  0x16   : > { %1762 = sst [smem:[#allocation20_spill]] %s1781_s21  ;;  %p367_p10 = pnand %p1094_p7, %p366_p8 }
  0x17   : > { %s1763_s23 = scalar_select %p1540_p9, 1, 0 }
  0x18   : > { %s244_s24 = ssub.s32 %s1416_s17, %s1781_s21  ;;  %s249_s25 = sadd.s32 1, %s1400_s13 }
  0x19   : > { %1764 = sst [smem:[#allocation21_spill]] %s1763_s23  ;;  %p247_p11 = scmp.eq.s32.totalorder %s244_s24, 0 }
  0x1a   : > { %370 = sbr.rel (%p367_p10) target bundleno = 592 (0x250), region = 52  ;;  %s1551_s27 = sand.u32 (!%p367_p10), 1, %s1396_s12  }
  0x1b   : > { %s1548_s26 = scalar_select %p247_p11, %s1400_s13, %s249_s25  }
  0x1c   : > { %p430_p12 = scmp.lt.s32.totalorder (!%p367_p10), %s1408_s15, 1  ;;  %p440_p13 = scmp.lt.s32.totalorder (!%p367_p10), %s1404_s14, 7 }
  0x1d   : > { %1765 = sst [smem:[#allocation22_spill]] %s1548_s26  ;;  %s423_s10 = scalar_lea.vmem (!%p367_p10), [#allocation7], %s1551_s27 }
  0x1e   : > { %p1101_p0 = scmp.ne.s32.totalorder (!%p367_p10), %s1404_s14, 0 }
  0x1f   : > { %s431_s28 = scalar_select %p430_p12, %s1408_s15, 1 }
  0x20   : > { %s441_s25 = scalar_select %p440_p13, %s1404_s14, 7 }
  0x21   : > { %s1110_s29 = sshll.u32 %s431_s28, 5  ;;  %s1098_s30 = sshll.u32 %s431_s28, 7 }
  0x22   : > { %s1559_s19 = scalar_lea.vmem %s1735_s0, %s1110_s29  ;;  %s1100_s24 = sshll.u32 %s431_s28, 3 }
  0x23   : > { %s1097_s21 = sshll.u32 %s441_s25, 4  ;;  %s1562_s20 = sadd.s32 %s1100_s24, %s441_s25 }
  0x24   : > { %s447_s17 = sadd.s32 %s1098_s30, %s1097_s21  ;;  %s459_s13 = scalar_lea.vmem %s1737_s2, %s1562_s20 }
  0x25   : > { %s1099_s12 = sshll.u32 %s447_s17, 2  ;;  %s429_s29 = scalar_lea.vmem [#allocation9], %s1551_s27 }
  0x26   : > { %s1571_s7 = scalar_lea.vmem %s1736_s1, %s1099_s12  ;;  %463 = sbr.rel (%p1101_p0) target bundleno = 47 (0x2f), region = 56 }
  0x2b   : > { %vm464_vm0 = vcmask 130048   ;;  %vm466_vm1 = vcmask 122880   ;;  %v1422_v1 = vmov 0.0  }
  0x2c   : > { %465 = vst.msk [vmem:[#allocation2] sm:$0xff] %vm464_vm0, %v1422_v1 }
  0x2d   : > { %467 = vst.msk [vmem:[#allocation3] sm:$0x1] %vm466_vm1, %v1422_v1  ;;  %468 = vst.msk [vmem:[#allocation4] sm:$0x1] %vm466_vm1, %v1422_v1 }
  0x2e   : > { %469 = vst.msk [vmem:[#allocation5] sm:$0x1] %vm466_vm1, %v1422_v1 }
  0x2f PF: > { %v1161_v2 = vld [vmem:[%s1559_s19 + $0x18] sm:$0xff]   ;;  %vm518_vm2 = vcmask 130048   ;;  %v1423_v5 = vmov 0.0   ;;  %v1160_v10 = vld [vmem:[%s1559_s19 + $0x10] sm:$0xff]   ;;  %vm1424_vm3 = vmmov 0   ;;  %v1159_v62 = vld [vmem:[%s1559_s19 + $0x8] sm:$0xff]  }
  0x30   : > { %v1164_v3 = vld [vmem:[%s1571_s7 + $0x18] sm:$0xff]   ;;  %1187 = vmatprep.subr.mxu1 %v1423_v5  ;;  %v1125_v6 = vunpack.c.l.bf16 %v1161_v2  ;;  %v1126_v7 = vunpack.c.h.bf16 %v1161_v2  ;;  %v1163_v11 = vld [vmem:[%s1571_s7 + $0x10] sm:$0xff]   ;;  %1182 = vmatprep.subr.mxu0 %v1423_v5  ;;  %v1122_v14 = vunpack.c.h.bf16 %v1160_v10  ;;  %v1121_v49 = vunpack.c.l.bf16 %v1160_v10  ;;  %v1162_v63 = vld [vmem:[%s1571_s7 + $0x8] sm:$0xff]   ;;  %p1105_p1 = scmp.ne.s32.totalorder %s1404_s14, 7 }
  0x31   : > { %v1168_v4 = vld [vmem:[%s1571_s7 + $0x38] sm:$0xff]   ;;  %v1141_v8 = vunpack.c.l.bf16 %v1164_v3  ;;  %v1142_v9 = vunpack.c.h.bf16 %v1164_v3  ;;  %v1138_v15 = vunpack.c.h.bf16 %v1163_v11  ;;  %1184 = vmatprep.mubr.msk.f32.mxu0 %vm1424_vm3, %v1423_v5  ;;  %1203 = vmatprep.mubr.msk.f32.mxu1 %vm1424_vm3, %v1423_v5  ;;  %v1167_v20 = vld [vmem:[%s1571_s7 + $0x30] sm:$0xff]   ;;  %v1137_v56 = vunpack.c.l.bf16 %v1163_v11 }
  0x32   : > { %v1157_v12 = vunpack.c.l.bf16 %v1168_v4  ;;  %v1158_v13 = vunpack.c.h.bf16 %v1168_v4  ;;  %v558_v17 = vmul.f32 %v1126_v7, %v1126_v7  ;;  %v557_v25 = vmul.f32 %v1125_v6, %v1125_v6  ;;  %v1166_v4 = vld [vmem:[%s1571_s7 + $0x28] sm:$0xff]  }
  0x33   : > { %v540_v16 = vsel %vm518_vm2, %v1142_v9, 0.0  ;;  %v566_v18 = vmul.f32 %v1142_v9, %v1142_v9  ;;  %v537_v19 = vsel %vm518_vm2, %v1141_v8, 0.0  ;;  %v641_v21 = vld [vmem:[#allocation2] sm:$0xff]  ;;  %v565_v29 = vmul.f32 %v1141_v8, %v1141_v8 }
  0x34   : > { %v541_v22 = vsel %vm518_vm2, %v1158_v13, 0.0  ;;  %v574_v23 = vmul.f32 %v1158_v13, %v1158_v13  ;;  %v538_v24 = vsel %vm518_vm2, %v1157_v12, 0.0  ;;  %1183 = vmatpush3.msra.mxu0 %v641_v21  ;;  %v573_v31 = vmul.f32 %v1157_v12, %v1157_v12 }
  0x35   : > { %v542_v26 = vadd.f32 %v541_v22, %v540_v16  ;;  %v596_v27 = vsel %vm518_vm2, %v566_v18, 0.0  ;;  %v539_v28 = vadd.f32 %v538_v24, %v537_v19  ;;  %1206 = vmatprep.subr.mxu0 %v1423_v5  ;;  %v1154_v32 = vunpack.c.h.bf16 %v1167_v20 }
  0x36   : > { %v597_v30 = vsel %vm518_vm2, %v574_v23, 0.0  ;;  %v534_v33 = vsel %vm518_vm2, %v1138_v15, 0.0  ;;  %v593_v37 = vsel %vm518_vm2, %v565_v29, 0.0  ;;  %v594_v38 = vsel %vm518_vm2, %v573_v31, 0.0 }
  0x37   : > { %v550_v34 = vadd.f32 %v1126_v7, %v542_v26  ;;  %v598_v35 = vadd.f32 %v597_v30, %v596_v27  ;;  %v549_v36 = vadd.f32 %v1125_v6, %v539_v28  ;;  %v535_v39 = vsel %vm518_vm2, %v1154_v32, 0.0 }
  0x38   : > { %v556_v40 = vmul.f32 %v1122_v14, %v1122_v14  ;;  %v564_v41 = vmul.f32 %v1138_v15, %v1138_v15  ;;  %v595_v44 = vadd.f32 %v594_v38, %v593_v37  ;;  %v536_v46 = vadd.f32 %v535_v39, %v534_v33  ;;  %v1112_v38 = vld [vmem:[%s1559_s19] sm:$0xff]  }
  0x39   : > { %v606_v42 = vadd.f32 %v598_v35, %v558_v17  ;;  %v622_v43 = vmul.f32 0.33333334, %v550_v34  ;;  %v621_v45 = vmul.f32 0.33333334, %v549_v36  ;;  %v572_v47 = vmul.f32 %v1154_v32, %v1154_v32  ;;  %v1128_v39 = vld [vmem:[%s1571_s7] sm:$0xff]  }
  0x3a   : > { %v590_v48 = vsel %vm518_vm2, %v564_v41, 0.0  ;;  %v605_v52 = vadd.f32 %v595_v44, %v557_v25  ;;  %v548_v54 = vadd.f32 %v1122_v14, %v536_v46  ;;  %v1153_v57 = vunpack.c.l.bf16 %v1167_v20 }
  0x3b   : > { %v614_v50 = vmul.f32 0.33333334, %v606_v42  ;;  %v630_v51 = vmul.f32 %v622_v43, %v622_v43  ;;  %v629_v53 = vmul.f32 %v621_v45, %v621_v45  ;;  %v591_v55 = vsel %vm518_vm2, %v572_v47, 0.0 }
  0x3c   : > { %v613_v59 = vmul.f32 0.33333334, %v605_v52  ;;  %v592_v60 = vadd.f32 %v591_v55, %v590_v48  ;;  %v555_v61 = vmul.f32 %v1121_v49, %v1121_v49  ;;  %v620_v0 = vmul.f32 0.33333334, %v548_v54  ;;  %v1165_v48 = vld [vmem:[%s1571_s7 + $0x20] sm:$0xff]  }
  0x3d   : > { %v638_v58 = vsub.f32 %v614_v50, %v630_v51  ;;  %v531_v1 = vsel %vm518_vm2, %v1137_v56, 0.0  ;;  %v532_v2 = vsel %vm518_vm2, %v1153_v57, 0.0  ;;  %v563_v3 = vmul.f32 %v1137_v56, %v1137_v56 }
  0x3e   : > { %v637_v6 = vsub.f32 %v613_v59, %v629_v53  ;;  %v604_v7 = vadd.f32 %v592_v60, %v556_v40  ;;  %v533_v8 = vadd.f32 %v532_v2, %v531_v1  ;;  %v571_v9 = vmul.f32 %v1153_v57, %v1153_v57  ;;  %v640_v57 = vld [vmem:[%s1739_s4] sm:$0xff] }
  0x3f   : > { %1188 = vmatpush3.msra.mxu1 %v638_v58  ;;  %v628_v10 = vmul.f32 %v620_v0, %v620_v0  ;;  %v587_v11 = vsel %vm518_vm2, %v563_v3, 0.0  ;;  %v1118_v12 = vunpack.c.h.bf16 %v1159_v62  ;;  %v1134_v13 = vunpack.c.h.bf16 %v1162_v63 }
  0x40   : > { %1189 = vmatprep.subr.mxu1 %v1423_v5  ;;  %v612_v14 = vmul.f32 0.33333334, %v604_v7  ;;  %v547_v15 = vadd.f32 %v1121_v49, %v533_v8  ;;  %v588_v16 = vsel %vm518_vm2, %v571_v9, 0.0  ;;  %v1150_v17 = vunpack.c.h.bf16 %v1166_v4 }
  0x41   : > { %1190 = vmatpush3.msra.mxu1 %v637_v6  ;;  %v589_v18 = vadd.f32 %v588_v16, %v587_v11  ;;  %v528_v19 = vsel %vm518_vm2, %v1134_v13, 0.0  ;;  %v554_v20 = vmul.f32 %v1118_v12, %v1118_v12  ;;  %v562_v21 = vmul.f32 %v1134_v13, %v1134_v13  ;;  %v790_v16 = vld [vmem:[%s1740_s5] sm:$0xff] }
  0x42   : > { %1191 = vmatprep.subr.mxu1 %v1423_v5  ;;  %v636_v22 = vsub.f32 %v612_v14, %v628_v10  ;;  %v619_v23 = vmul.f32 0.33333334, %v547_v15  ;;  %v529_v24 = vsel %vm518_vm2, %v1150_v17, 0.0  ;;  %v570_v25 = vmul.f32 %v1150_v17, %v1150_v17 }
  0x43   : > { %v603_v26 = vadd.f32 %v589_v18, %v555_v61  ;;  %v530_v27 = vadd.f32 %v529_v24, %v528_v19  ;;  %v584_v28 = vsel %vm518_vm2, %v562_v21, 0.0  ;;  %v1117_v29 = vunpack.c.l.bf16 %v1159_v62 }
  0x44   : > { %1192 = vmatpush3.msra.mxu1 %v636_v22  ;;  %v627_v30 = vmul.f32 %v619_v23, %v619_v23  ;;  %v585_v31 = vsel %vm518_vm2, %v570_v25, 0.0  ;;  %v1133_v32 = vunpack.c.l.bf16 %v1162_v63  ;;  %v1149_v33 = vunpack.c.l.bf16 %v1166_v4 }
  0x45   : > { %1193 = vmatprep.subr.mxu1 %v1423_v5  ;;  %v611_v34 = vmul.f32 0.33333334, %v603_v26  ;;  %v546_v35 = vadd.f32 %v1118_v12, %v530_v27  ;;  %v586_v36 = vadd.f32 %v585_v31, %v584_v28  ;;  %v553_v37 = vmul.f32 %v1117_v29, %v1117_v29  ;;  %v800_v31 = vld [vmem:[#allocation6] sm:$0x1] }
  0x46   : > { %v525_v40 = vsel %vm518_vm2, %v1133_v32, 0.0  ;;  %v526_v41 = vsel %vm518_vm2, %v1149_v33, 0.0  ;;  %v561_v42 = vmul.f32 %v1133_v32, %v1133_v32  ;;  %v569_v43 = vmul.f32 %v1149_v33, %v1149_v33 }
  0x47   : > { %v635_v44 = vsub.f32 %v611_v34, %v627_v30  ;;  %v602_v45 = vadd.f32 %v586_v36, %v554_v20  ;;  %v618_v46 = vmul.f32 0.33333334, %v546_v35  ;;  %v527_v47 = vadd.f32 %v526_v41, %v525_v40 }
  0x48   : > { %v581_v49 = vsel %vm518_vm2, %v561_v42, 0.0  ;;  %v582_v50 = vsel %vm518_vm2, %v569_v43, 0.0  ;;  %v1114_v51 = vunpack.c.h.bf16 %v1112_v38  ;;  %v1130_v52 = vunpack.c.h.bf16 %v1128_v39 }
  0x49   : > { %1194 = vmatpush3.msra.mxu1 %v635_v44  ;;  %v610_v53 = vmul.f32 0.33333334, %v602_v45  ;;  %v626_v54 = vmul.f32 %v618_v46, %v618_v46  ;;  %v545_v55 = vadd.f32 %v1117_v29, %v527_v47  ;;  %v583_v56 = vadd.f32 %v582_v50, %v581_v49 }
  0x4a   : > { %1195 = vmatprep.subr.mxu1 %v1423_v5  ;;  %v1146_v58 = vunpack.c.h.bf16 %v1165_v48  ;;  %v522_v59 = vsel %vm518_vm2, %v1130_v52, 0.0  ;;  %v552_v60 = vmul.f32 %v1114_v51, %v1114_v51  ;;  %v560_v61 = vmul.f32 %v1130_v52, %v1130_v52 }
  0x4b   : > { %v634_v62 = vsub.f32 %v610_v53, %v626_v54  ;;  %v601_v63 = vadd.f32 %v583_v56, %v553_v37  ;;  %v617_v0 = vmul.f32 0.33333334, %v545_v55  ;;  %vm642_vm4 = vcmask 64512  }
  0x4c   : > { %v523_v1 = vsel %vm518_vm2, %v1146_v58, 0.0  ;;  %v568_v2 = vmul.f32 %v1146_v58, %v1146_v58  ;;  %v578_v3 = vsel %vm518_vm2, %v560_v61, 0.0  ;;  %1185 = vmatmul.mubr.msk.f32.vlgmr.msra.gmra.mxu0 %vm642_vm4, %v640_v57  ;;  %v1113_v4 = vunpack.c.l.bf16 %v1112_v38  ;;  %v639_v38 = vld [vmem:[%s1738_s3] sm:$0xff]  ;;  %v887_v58 = vld [vmem:[#allocation5] sm:$0x1] }
  0x4d   : > { %1196 = vmatpush3.msra.mxu1 %v634_v62  ;;  %v609_v6 = vmul.f32 0.33333334, %v601_v63  ;;  %v625_v7 = vmul.f32 %v617_v0, %v617_v0  ;;  %v524_v8 = vadd.f32 %v523_v1, %v522_v59  ;;  %v1129_v9 = vunpack.c.l.bf16 %v1128_v39  ;;  %1208 = vmatprep.mubr.msk.f32.mxu0 %vm1424_vm3, %v1423_v5  ;;  %v886_v57 = vld [vmem:[%s459_s13] sm:$0x1]  ;;  %v895_v59 = vld [vmem:[#allocation3] sm:$0x1] }
  0x4e   : > { %1197 = vmatprep.subr.mxu1 %v1423_v5  ;;  %v579_v10 = vsel %vm518_vm2, %v568_v2, 0.0  ;;  %v1145_v11 = vunpack.c.l.bf16 %v1165_v48  ;;  %v551_v23 = vmul.f32 %v1113_v4, %v1113_v4  ;;  %v1425_v24 = vmov 0   ;;  %v891_v61 = vld [vmem:[#allocation4] sm:$0x1] }
  0x4f   : > { %v633_v12 = vsub.f32 %v609_v6, %v625_v7  ;;  %v544_v13 = vadd.f32 %v1114_v51, %v524_v8  ;;  %v580_v14 = vadd.f32 %v579_v10, %v578_v3  ;;  %v519_v15 = vsel %vm518_vm2, %v1129_v9, 0.0  ;;  %1291 = vset.pattern.permute.xlu0 %v1425_v24 }
  0x50   : > { %v520_v17 = vsel %vm518_vm2, %v1145_v11, 0.0  ;;  %v559_v18 = vmul.f32 %v1129_v9, %v1129_v9  ;;  %v567_v19 = vmul.f32 %v1145_v11, %v1145_v11  ;;  %793 = vperm.xlu0 %1291, %v790_v16   ;;  %vm716_vm5 = vcmask 523264  }
  0x51   : > { %1198 = vmatpush3.msra.mxu1 %v633_v12  ;;  %v600_v20 = vadd.f32 %v580_v14, %v552_v60  ;;  %v616_v21 = vmul.f32 0.33333334, %v544_v13  ;;  %v521_v22 = vadd.f32 %v520_v17, %v519_v15  ;;  %v806_v47 = vlaneseq }
  0x52   : > { %1199 = vmatprep.subr.mxu1 %v1423_v5  ;;  %v575_v25 = vsel %vm518_vm2, %v559_v18, 0.0  ;;  %v576_v26 = vsel %vm518_vm2, %v567_v19, 0.0  ;;  %vm889_vm6 = vcmask 122880  }
  0x53   : > { %v608_v27 = vmul.f32 0.33333334, %v600_v20  ;;  %v624_v28 = vmul.f32 %v616_v21, %v616_v21  ;;  %v543_v29 = vadd.f32 %v1113_v4, %v521_v22  ;;  %v577_v30 = vadd.f32 %v576_v26, %v575_v25 }
  0x54   : > { %803 = vperm.xlu0 %1291, %v800_v31   ;;  %v807_v48 = vshrl.u32 %v806_v47, 7 }
  0x55   : > { %v632_v32 = vsub.f32 %v608_v27, %v624_v28  ;;  %v599_v33 = vadd.f32 %v577_v30, %v551_v23  ;;  %v615_v34 = vmul.f32 0.33333334, %v543_v29 }
  0x56   : > { %v808_v49 = vsub.s32 0, %v807_v48 }
  0x57   : > { %1200 = vmatpush3.msra.mxu1 %v632_v32  ;;  %v607_v35 = vmul.f32 0.33333334, %v599_v33  ;;  %v623_v36 = vmul.f32 %v615_v34, %v615_v34 }
  0x58   : > { %1201 = vmatprep.subr.mxu1 %v1423_v5  ;;  %v799_v5 = vld [vmem:[%s1741_s6] sm:$0x1] }
  0x59   : > { %v631_v37 = vsub.f32 %v607_v35, %v623_v36 }
  0x5b   : > { %1202 = vmatpush3.msra.mxu1 %v631_v37 }
  0x5c   : > { %1204 = vmatmul.mubr.msk.f32.vlgmr.msra.gmra.mxu1 %vm716_vm5, %v639_v38 }
  0xcb   : > { %v794_v43 = vpop.permute.xlu0 %793 }
  0xcf   : > { %v804_v50 = vpop.permute.xlu0 %803 }
  0xd0   : > { %v809_v51 = vrot.slane %v804_v50, %v808_v49 }
 0x10c   : > { %v712_v39 = vpop.f32.mrf.mxu0 }
 0x10e   : > { %v1186_v40 = vpop.f32.mrf.mxu0 }
 0x11c   : > { %v786_v41 = vpop.f32.mrf.mxu1 }
 0x11d   : > { %v787_v42 = vadd.f32 %v786_v41, %v712_v39 }
 0x11e   : > { %v1205_v44 = vpop.f32.mrf.mxu1 }
 0x11f   : > { %v796_v45 = vadd.f32 %v794_v43, %v787_v42 }
 0x121   : > { %1292 = vtanh.f32 %v796_v45 }
 0x12e   : > { %v1293_v46 = vpop.eup %1292 }
 0x12f   : > { %798 = vst.msk [vmem:[#allocation2] sm:$0xff] %vm518_vm2, %v1293_v46  ;;  %1207 = vmatpush3.msra.mxu0 %v1293_v46 }
 0x130   : > { %1209 = vmatmul.mubr.msk.f32.vlgmr.msra.gmra.mxu0 %vm642_vm4, %v799_v5 }
 0x1f0   : > { %v879_v52 = vpop.f32.mrf.mxu0 }
 0x1f1   : > { %v880_v53 = vadd.f32 %v879_v52, %v809_v51 }
 0x1f2   : > { %v1210_v54 = vpop.f32.mrf.mxu0 }
 0x1f3   : > { %v883_v55 = vmin.f32 %v880_v53, 60.0 }
 0x1f5   : > { %v884_v56 = vmul.f32 1.442695, %v883_v55 }
 0x1f7   : > { %1294 = vpow2.f32 %v884_v56 }
 0x204   : > { %v1295_v60 = vpop.eup %1294 }
 0x205   : > { %v888_v62 = vmax.f32 %v887_v58, %v1295_v60  ;;  %v892_v63 = vmul.f32 %v1295_v60, %v886_v57  ;;  %v896_v0 = vadd.f32 %v1295_v60, %v895_v59  ;;  %901 = sbr.rel (%p1105_p1) target bundleno = 546 (0x222), region = 60 }
 0x207   : > { %890 = vst.msk [vmem:[#allocation5] sm:$0x1] %vm889_vm6, %v888_v62  ;;  %v893_v1 = vadd.f32 %v892_v63, %v891_v61  ;;  %897 = vst.msk [vmem:[#allocation3] sm:$0x1] %vm889_vm6, %v896_v0 }
 0x209   : > { %894 = vst.msk [vmem:[#allocation4] sm:$0x1] %vm889_vm6, %v893_v1 }
 0x20e   : > { %v902_v2 = vld [vmem:[#allocation3] sm:$0x1]  ;;  %v908_v6 = vld [vmem:[#allocation5] sm:$0x1] }
 0x20f   : > { %v903_v3 = vadd.f32 1e-10, %v902_v2 }
 0x210   : > { %v905_v4 = vld [vmem:[#allocation4] sm:$0x1] }
 0x211   : > { %1296 = vrcp.f32 %v903_v3 }
 0x21e   : > { %v1297_v7 = vpop.eup %1296 }
 0x21f   : > { %v906_v8 = vmul.f32 %v1297_v7, %v905_v4  ;;  %v909_v9 = vmul.f32 %v1297_v7, %v908_v6 }
 0x221   : > { %907 = vst.msk [vmem:[%s423_s10] sm:$0x1] %vm889_vm6, %v906_v8  ;;  %910 = vst.msk [vmem:[%s429_s29] sm:$0x1] %vm889_vm6, %v909_v9 }
 0x222 PF: > { %s1106_s13 = sshll.u32 %s1408_s15, 4  ;;  %s929_s19 = sshll.u32 %s423_s10, 4  ;;  %s930_s19 = int_to_ptr.vmem [resolvable:$true] %s929_s19 }
 0x223   : > { %s927_s18 = scalar_lea.hbm %s1743_s8, %s1106_s13  ;;  %s912_s24 = scalar_lea.sflag [#allocation8], %s1551_s27 }
 0x224   : > { %s1298_s25 = scalar_lea.vmem %s930_s19, 16  ;;  %s1426_s11 = smov [#allocation7]  }
 0x225   : > { %p1299_p2 = scmp.ne.s32.totalorder %s930_s19, %s1298_s25  ;;  %s1302_s12 = sshll.u32 %s1426_s11, 4  ;;  %s1303_s12 = int_to_ptr.vmem [resolvable:$false] %s1302_s12 }
 0x226   : > { %s1304_s16 = scalar_lea.vmem %s1303_s12, 32  ;;  %p1305_p6 = scmp.lt.s32.totalorder %s930_s19, %s1303_s12 }
 0x227   : > { %p1300_p4 = pnand %p1299_p2, %p1530_p3  ;;  %p1306_p7 = scmp.lt.s32.totalorder %s1304_s16, %s1298_s25 }
 0x229   : > { %p1301_p5 = pneg %p1300_p4  ;;  %p1307_p8 = por %p1306_p7, %p1305_p6 }
 0x22b   : > { %p1308_p10 = pnand %p1307_p8, %p1301_p5 }
 0x22d   : > { %1311 = shalt.err (!%p1308_p10)
}
 0x22e   : > { %s1312_s17 = scalar_lea.hbm %s927_s18, 16  ;;  %s1316_s21 = scalar_lea.hbm %s1743_s8, 32 }
 0x22f   : > { %p1313_p11 = scmp.ne.s32.totalorder %s927_s18, %s1312_s17  ;;  %p1317_p0 = scmp.lt.s32.totalorder %s927_s18, %s1743_s8 }
 0x230   : > { %p1318_p1 = scmp.lt.s32.totalorder %s1316_s21, %s1312_s17 }
 0x231   : > { %p1314_p12 = pnand %p1313_p11, %p1530_p3 }
 0x232   : > { %p1319_p2 = por %p1318_p1, %p1317_p0 }
 0x233   : > { %p1315_p13 = pneg %p1314_p12 }
 0x235   : > { %p1320_p4 = pnand %p1319_p2, %p1315_p13 }
 0x237   : > { %1323 = shalt.err (!%p1320_p4)
}
 0x238   : > { %1211 = dma.vmem_to_hbm [thread:$0]  (%p1530_p3), %s930_s19, 16, %s927_s18, %s912_s24  }
 0x239   : > { %s941_s14 = scalar_lea.hbm %s1744_s9, %s1106_s13  ;;  %s943_s20 = sshll.u32 %s429_s29, 4  ;;  %s944_s20 = int_to_ptr.vmem [resolvable:$true] %s943_s20 }
 0x23a   : > { %s916_s25 = scalar_lea.sflag [#allocation10], %s1551_s27  ;;  %s1324_s11 = scalar_lea.vmem %s944_s20, 16 }
 0x23b   : > { %p1325_p5 = scmp.ne.s32.totalorder %s944_s20, %s1324_s11  ;;  %s1427_s12 = smov [#allocation9]  }
 0x23c   : > { %s1328_s16 = sshll.u32 %s1427_s12, 4  ;;  %s1329_s16 = int_to_ptr.vmem [resolvable:$false] %s1328_s16 }
 0x23d   : > { %p1326_p6 = pnand %p1325_p5, %p1530_p3  ;;  %s1330_s17 = scalar_lea.vmem %s1329_s16, 32 }
 0x23e   : > { %p1331_p8 = scmp.lt.s32.totalorder %s944_s20, %s1329_s16  ;;  %p1332_p10 = scmp.lt.s32.totalorder %s1330_s17, %s1324_s11 }
 0x23f   : > { %p1327_p7 = pneg %p1326_p6 }
 0x240   : > { %p1333_p11 = por %p1332_p10, %p1331_p8 }
 0x242   : > { %p1334_p12 = pnand %p1333_p11, %p1327_p7 }
 0x244   : > { %1337 = shalt.err (!%p1334_p12)
}
 0x245   : > { %s1338_s15 = scalar_lea.hbm %s941_s14, 16  ;;  %s1342_s13 = scalar_lea.hbm %s1744_s9, 32 }
 0x246   : > { %p1339_p13 = scmp.ne.s32.totalorder %s941_s14, %s1338_s15  ;;  %p1343_p2 = scmp.lt.s32.totalorder %s941_s14, %s1744_s9 }
 0x247   : > { %p1344_p4 = scmp.lt.s32.totalorder %s1342_s13, %s1338_s15 }
 0x248   : > { %p1340_p0 = pnand %p1339_p13, %p1530_p3 }
 0x249   : > { %p1345_p5 = por %p1344_p4, %p1343_p2 }
 0x24a   : > { %p1341_p1 = pneg %p1340_p0 }
 0x24c   : > { %p1346_p6 = pnand %p1345_p5, %p1341_p1 }
 0x24e   : > { %1349 = shalt.err (!%p1346_p6)
}
 0x24f   : > { %1212 = dma.vmem_to_hbm [thread:$0]  (%p1530_p3), %s944_s20, 16, %s941_s14, %s916_s25  }
 0x250 PF: > { %s1766_s24 = sld [smem:[#allocation18_spill]] }
 0x251   : > { %s1767_s10 = sld [smem:[#allocation13_spill]] }
 0x256   : > { %p1222_p7 = scmp.ge.s32.totalorder %s1766_s24, 2 }
 0x257   : > { %s955_s21 = sand.u32 1, %s1767_s10  }
 0x258   : > { %p1216_p8 = pnand %p1222_p7, %p1540_p9  ;;  %s956_s23 = scalar_lea.sflag [#allocation8], %s955_s21 }
 0x25a   : > { %p1217_p10 = pneg %p1216_p8 }
 0x25c   : > { %1383 = dma.done.wait (%p1217_p10), %s956_s23, 16  }
 0x25d   : > { %1385 = vsyncadd (%p1217_p10), %s956_s23, 4294967280  ;;  %s964_s26 = scalar_lea.sflag [#allocation10], %s955_s21 }
 0x25e   : > { %1387 = dma.done.wait (%p1217_p10), %s964_s26, 16  }
 0x25f   : > { %1389 = vsyncadd (%p1217_p10), %s964_s26, 4294967280  ;;  %s28_s7 = sadd.s32 1, %s1766_s24   ;;  %s1769_s11 = sld [smem:[#allocation14_spill]] }
 0x260   : > { %p25_p11 = scmp.ge.s32.totalorder %s28_s7, 18   ;;  %s1770_s12 = sld [smem:[#allocation15_spill]] }
 0x261   : > { %s1771_s13 = sld [smem:[#allocation22_spill]] }
 0x262   : > { %s1772_s14 = sld [smem:[#allocation16_spill]]  ;;  %27 = sbr.rel (!%p25_p11) target bundleno = 10 (0xa), region = 118 }
 0x263   : > { %s1773_s15 = sld [smem:[#allocation17_spill]] }
 0x264   : > { %s1774_s16 = sld [smem:[#allocation19_spill]] }
 0x265   : > { %s1775_s17 = sld [smem:[#allocation20_spill]] }
 0x267   :  { %968 = vsyncpa [#allocation8], 1 }
 0x268   :  { %970 = vsyncpa [#allocation8 + $0x1], 1 }
 0x269   :  { %971 = vsyncpa [#allocation10], 1 }
 0x26a   :  { %973 = vsyncpa [#allocation10 + $0x1], 1 }

</bundles_post_ra>
